<compile_context>
chip_gen: v6e
topology: v6e:2x2x1
jax: 0.10.0
libtpu: 0.0.40
codegen_flags: <defaults>
</compile_context>

<pallas_src>
import functools

import jax
import jax.numpy as jnp
from jax import lax
from jax.experimental import pallas as pl
from jax.experimental.pallas import tpu as pltpu


def _mlp_channel_kernel(x_ref, w1_ref, b1_ref, w2_ref, b2_ref, o_ref, *,
                        m_chunk, num_chunks):
    # x_ref:  (C, TS)   channels on sublanes, spatial tile on lanes
    # w1_ref: (M, C)    conv-style (out_ch, in_ch)
    # b1_ref: (M, 1)
    # w2_ref: (C, M)
    # b2_ref: (C, 1)
    # o_ref:  (C, TS)
    x = x_ref[...]

    acc = None
    for c in range(num_chunks):
        lo = c * m_chunk
        hi = lo + m_chunk
        # fc1 chunk: (m_chunk, C) @ (C, TS) -> (m_chunk, TS), f32 accumulation.
        h = jnp.dot(w1_ref[lo:hi, :], x, preferred_element_type=jnp.float32)
        h = h + b1_ref[lo:hi, :].astype(jnp.float32)

        # Exact (erf) GELU in f32 -- matches torch.nn.GELU() default.
        # TODO(synk): on v6e/v7x a bf16 / tanh-approx GELU moves the activation
        # off the f32 VALU path (~1.3-1.6x at MLP-sized dims) but changes
        # numerics vs torch's exact erf; kept exact here.
        h = 0.5 * h * (1.0 + lax.erf(h * jnp.float32(0.7071067811865476)))

        # fc2 chunk: (C, m_chunk) @ (m_chunk, TS) -> (C, TS).
        part = jnp.dot(w2_ref[:, lo:hi], h.astype(w2_ref.dtype),
                       preferred_element_type=jnp.float32)
        acc = part if acc is None else acc + part

    acc = acc + b2_ref[...].astype(jnp.float32)
    o_ref[...] = acc.astype(o_ref.dtype)


def _vmem_capacity_bytes():
    """Physical VMEM per TensorCore; conservative fallback if query fails."""
    try:
        info = pltpu.get_tpu_info()
        cap = int(getattr(info, "vmem_capacity_bytes", 0) or 0)
        if cap > 0:
            return cap
    except Exception:
        pass
    return 64 * 1024 * 1024   # v7x per-TC size -- safe everywhere


def _choose_m_chunk(M):
    """Chunk size for the mlp_dim axis (bounds the (M, ts) f32 intermediate)."""
    if M <= 1024:
        return M
    for mc in range(1024, 255, -256):        # prefer multiples of the 256 MXU
        if M % mc == 0:
            return mc
    for mc in range(1024, 127, -1):
        if M % mc == 0:
            return mc
    return M


def _cdiv(a, b):
    return -(-a // b)


def _round_down_128(v):
    return max(128, (v // 128) * 128)


def _const_block_spec(shape):
    """Full-array block, constant index map, single-buffered when supported."""
    idx = lambda n, s, _shape_len=len(shape): (0,) * _shape_len
    if hasattr(pl, "Buffered"):
        try:
            return pl.BlockSpec(shape, idx, pipeline_mode=pl.Buffered(1))
        except TypeError:
            pass
    return pl.BlockSpec(shape, idx)


def mlp_channel_forward(x_nchw, w1, b1, w2, b2):
    """MlpChannel forward.

    x_nchw: (N, C, H, W)
    w1: (mlp_dim, C)   -- PyTorch Conv2d(fc1).weight squeezed to 2-D
    b1: (mlp_dim,)
    w2: (C, mlp_dim)   -- PyTorch Conv2d(fc2).weight squeezed to 2-D
    b2: (C,)
    """
    N, C, H, W = x_nchw.shape
    M = w1.shape[0]
    HW = H * W

    # Native bf16 MXU path on all generations: if activations are bf16, cast
    # f32 weights once in the wrapper (halves weight VMEM + DMA); biases and
    # accumulation stay f32.
    if x_nchw.dtype == jnp.bfloat16:
        w1 = w1.astype(jnp.bfloat16)
        w2 = w2.astype(jnp.bfloat16)
    b1_2d = b1.astype(jnp.float32).reshape(M, 1)
    b2_2d = b2.astype(jnp.float32).reshape(C, 1)

    xb = jnp.dtype(x_nchw.dtype).itemsize
    wb = jnp.dtype(w1.dtype).itemsize

    m_chunk = _choose_m_chunk(M)
    if M % m_chunk != 0:
        m_chunk = M
    num_chunks = M // m_chunk

    # --- Generation-aware VMEM budgeting (bytes, not lane counts). ---
    vmem_cap = _vmem_capacity_bytes()
    vmem_limit = int(vmem_cap * 0.75)       # ~48 MiB on v7x, ~96 MiB on v5e/v6e
    weight_bytes = 2 * M * C * wb + (M + C) * 4      # single-buffered weights
    headroom = 4 * 1024 * 1024                       # internal scratch / slack
    tile_budget = max(vmem_limit - weight_bytes - headroom, 4 * 1024 * 1024)

    # Resident bytes per spatial lane:
    #   x (2x buffered) + out (2x buffered) + f32 h-chunk (+ downcast) + f32 acc
    per_lane = 4 * C * xb + (8 + wb) * m_chunk + 4 * C
    ts_from_budget = tile_budget // per_lane
    ts_from_target = (8 * 1024 * 1024) // max(C * xb, 1)   # ~8 MiB x block
    hw_ceil = _cdiv(HW, 128) * 128

    ts = _round_down_128(min(ts_from_budget, ts_from_target))
    ts = min(ts, hw_ceil)

    # Keep enough grid steps so both v7x TensorCores get work (but stay
    # lane-dense: never shrink below 512 lanes for this reason alone).
    while N * _cdiv(HW, ts) < 4 and ts > 512:
        ts = _round_down_128(ts // 2)

    num_tiles = _cdiv(HW, ts)
    ts = _cdiv(_cdiv(HW, num_tiles), 128) * 128   # rebalance to minimize padding
    HW_pad = ts * num_tiles

    # NCHW-native: (N, C, H, W) -> (N, C, H*W) is a free (contiguous) reshape.
    # Pad the spatial axis to a multiple of the tile so every block is
    # lane-dense; the padded tail is trimmed after the kernel.
    x3 = x_nchw.reshape(N, C, HW)
    if HW_pad != HW:
        x3 = jnp.pad(x3, ((0, 0), (0, 0), (0, HW_pad - HW)))

    grid = (N, num_tiles)
    kernel = functools.partial(_mlp_channel_kernel,
                               m_chunk=m_chunk, num_chunks=num_chunks)

    out3 = pl.pallas_call(
        kernel,
        out_shape=jax.ShapeDtypeStruct((N, C, HW_pad), x_nchw.dtype),
        grid_spec=pltpu.PrefetchScalarGridSpec(
            num_scalar_prefetch=0,
            grid=grid,
            in_specs=[
                # x tile: batch dim squeezed, (C, ts) in VMEM, spatial on lanes.
                pl.BlockSpec((None, C, ts), lambda n, s: (n, 0, s)),
                # Weights / biases: full arrays, constant index maps,
                # single-buffered (Buffered(1)) to halve their VMEM footprint.
                _const_block_spec((M, C)),
                _const_block_spec((M, 1)),
                _const_block_spec((C, M)),
                _const_block_spec((C, 1)),
            ],
            out_specs=pl.BlockSpec((None, C, ts), lambda n, s: (n, 0, s)),
        ),
        compiler_params=pltpu.CompilerParams(
            dimension_semantics=("parallel", "parallel"),
            vmem_limit_bytes=vmem_limit,
        ),
    )(x3, w1, b1_2d, w2, b2_2d)

    if HW_pad != HW:
        out3 = out3[:, :, :HW]
    # (N, C, H*W) -> (N, C, H, W): free reshape, no transpose.
    return out3.reshape(N, C, H, W)


def _reference_forward(x_nchw, w1, b1, w2, b2):
    """Pure-JAX reference of the PyTorch module (1x1 convs as channel matmuls)."""
    x = x_nchw.astype(jnp.float32)
    h = jnp.einsum("mc,nchw->nmhw", w1.astype(jnp.float32), x)
    h = h + b1.astype(jnp.float32)[None, :, None, None]
    h = 0.5 * h * (1.0 + lax.erf(h / jnp.sqrt(2.0)))
    o = jnp.einsum("cm,nmhw->nchw", w2.astype(jnp.float32), h)
    o = o + b2.astype(jnp.float32)[None, :, None, None]
    return o.astype(x_nchw.dtype)


if __name__ == "__main__":
    # Module config: MlpChannel(hidden_size=4, mlp_dim=32)
    hidden_size = 4
    mlp_dim = 32
    N, H, W = 2, 16, 16

    key = jax.random.PRNGKey(0)
    kx, k1, k2, k3, k4 = jax.random.split(key, 5)

    x = jax.random.normal(kx, (N, hidden_size, H, W), dtype=jnp.float32)

    # Conv2d(hidden_size, mlp_dim, 1): weight (mlp_dim, hidden_size, 1, 1) -> (mlp_dim, hidden_size)
    w1 = (jax.random.normal(k1, (mlp_dim, hidden_size), dtype=jnp.float32)
          * (1.0 / jnp.sqrt(hidden_size)))
    b1 = jax.random.normal(k2, (mlp_dim,), dtype=jnp.float32) * 0.01
    # Conv2d(mlp_dim, hidden_size, 1): weight -> (hidden_size, mlp_dim)
    w2 = (jax.random.normal(k3, (hidden_size, mlp_dim), dtype=jnp.float32)
          * (1.0 / jnp.sqrt(mlp_dim)))
    b2 = jax.random.normal(k4, (hidden_size,), dtype=jnp.float32) * 0.01

    out = mlp_channel_forward(x, w1, b1, w2, b2)
    out = jax.block_until_ready(out)

    ref = _reference_forward(x, w1, b1, w2, b2)
    assert out.shape == (N, hidden_size, H, W)
    assert jnp.allclose(out, ref, atol=1e-5, rtol=1e-5), "mismatch vs reference"

    print("KERNEL_OK")
</pallas_src>

<mosaic_0001>
module attributes {stable_mosaic.version = 11 : i64} {
  func.func @_mlp_channel_kernel(%arg0: i32, %arg1: i32, %arg2: memref<1x4x256xf32, #tpu.memory_space<vmem>>, %arg3: memref<32x4xf32, #tpu.memory_space<vmem>>, %arg4: memref<32x1xf32, #tpu.memory_space<vmem>>, %arg5: memref<4x32xf32, #tpu.memory_space<vmem>>, %arg6: memref<4x1xf32, #tpu.memory_space<vmem>>, %arg7: memref<1x4x256xf32, #tpu.memory_space<vmem>>) attributes {dimension_semantics = [#tpu.dimension_semantics<parallel>, #tpu.dimension_semantics<parallel>], iteration_bounds = array<i64: 2, 1>, scalar_prefetch = 0 : i64, scratch_operands = 0 : i64, tpu.core_type = #tpu.core_type<tc>, window_params = [{transform_indices = @transform_0, window_bounds = array<i64: 1, 4, 256>}, {pipeline_mode = #tpu.pipeline_mode<synchronous>, transform_indices = @transform_1, window_bounds = array<i64: 32, 4>}, {pipeline_mode = #tpu.pipeline_mode<synchronous>, transform_indices = @transform_2, window_bounds = array<i64: 32, 1>}, {pipeline_mode = #tpu.pipeline_mode<synchronous>, transform_indices = @transform_3, window_bounds = array<i64: 4, 32>}, {pipeline_mode = #tpu.pipeline_mode<synchronous>, transform_indices = @transform_4, window_bounds = array<i64: 4, 1>}, {transform_indices = @transform_5, window_bounds = array<i64: 1, 4, 256>}]} {
    %c0 = arith.constant 0 : index
    %c0_0 = arith.constant 0 : index
    %c0_1 = arith.constant 0 : index
    %0 = vector.load %arg2[%c0, %c0_0, %c0_1] : memref<1x4x256xf32, #tpu.memory_space<vmem>>, vector<1x4x256xf32>
    %1 = vector.shape_cast %0 : vector<1x4x256xf32> to vector<4x256xf32>
    %c0_2 = arith.constant 0 : index
    %c0_3 = arith.constant 0 : index
    %2 = vector.load %arg3[%c0_2, %c0_3] : memref<32x4xf32, #tpu.memory_space<vmem>>, vector<32x4xf32>
    %cst = arith.constant dense<0.000000e+00> : vector<32x256xf32>
    %3 = tpu.matmul %2, %1, %cst {dimension_numbers = #tpu.dot_dimension_numbers<[1], [0], [0], [1], [0, 0, 1, 1], [], []>} : vector<32x4xf32>, vector<4x256xf32>, vector<32x256xf32> -> vector<32x256xf32>
    %c0_4 = arith.constant 0 : index
    %c0_5 = arith.constant 0 : index
    %4 = vector.load %arg4[%c0_4, %c0_5] : memref<32x1xf32, #tpu.memory_space<vmem>>, vector<32x1xf32>
    %5 = vector.broadcast %4 : vector<32x1xf32> to vector<32x256xf32>
    %6 = arith.addf %3, %5 : vector<32x256xf32>
    %cst_6 = arith.constant 5.000000e-01 : f32
    %7 = vector.broadcast %cst_6 : f32 to vector<32x256xf32>
    %8 = arith.mulf %7, %6 : vector<32x256xf32>
    %cst_7 = arith.constant 0.707106769 : f32
    %9 = vector.broadcast %cst_7 : f32 to vector<32x256xf32>
    %10 = arith.mulf %6, %9 : vector<32x256xf32>
    %11 = math.erf %10 : vector<32x256xf32>
    %cst_8 = arith.constant 1.000000e+00 : f32
    %12 = vector.broadcast %cst_8 : f32 to vector<32x256xf32>
    %13 = arith.addf %12, %11 : vector<32x256xf32>
    %14 = arith.mulf %8, %13 : vector<32x256xf32>
    %c0_9 = arith.constant 0 : index
    %c0_10 = arith.constant 0 : index
    %15 = vector.load %arg5[%c0_9, %c0_10] : memref<4x32xf32, #tpu.memory_space<vmem>>, vector<4x32xf32>
    %cst_11 = arith.constant dense<0.000000e+00> : vector<4x256xf32>
    %16 = tpu.matmul %15, %14, %cst_11 {dimension_numbers = #tpu.dot_dimension_numbers<[1], [0], [0], [1], [0, 0, 1, 1], [], []>} : vector<4x32xf32>, vector<32x256xf32>, vector<4x256xf32> -> vector<4x256xf32>
    %c0_12 = arith.constant 0 : index
    %c0_13 = arith.constant 0 : index
    %17 = vector.load %arg6[%c0_12, %c0_13] : memref<4x1xf32, #tpu.memory_space<vmem>>, vector<4x1xf32>
    %18 = vector.broadcast %17 : vector<4x1xf32> to vector<4x256xf32>
    %19 = arith.addf %16, %18 : vector<4x256xf32>
    %c0_14 = arith.constant 0 : index
    %c0_15 = arith.constant 0 : index
    %c0_16 = arith.constant 0 : index
    %20 = vector.load %arg7[%c0_14, %c0_15, %c0_16] : memref<1x4x256xf32, #tpu.memory_space<vmem>>, vector<1x4x256xf32>
    %21 = vector.shape_cast %20 : vector<1x4x256xf32> to vector<4x256xf32>
    %22 = vector.shape_cast %19 : vector<4x256xf32> to vector<1x4x256xf32>
    tpu.vector_store %arg7[%c0_14, %c0_15, %c0_16], %22 {strides = array<i32>} : memref<1x4x256xf32, #tpu.memory_space<vmem>>, vector<1x4x256xf32>,
    return
  }
  func.func @transform_0(%arg0: i32, %arg1: i32) -> (i32, i32, i32) {
    %c0_i32 = arith.constant 0 : i32
    %c0_i32_0 = arith.constant 0 : i32
    return %arg0, %c0_i32, %arg1 : i32, i32, i32
  }
  func.func @transform_1(%arg0: i32, %arg1: i32) -> (i32, i32) {
    %c0_i32 = arith.constant 0 : i32
    %c0_i32_0 = arith.constant 0 : i32
    %c0_i32_1 = arith.constant 0 : i32
    return %c0_i32, %c0_i32_0 : i32, i32
  }
  func.func @transform_2(%arg0: i32, %arg1: i32) -> (i32, i32) {
    %c0_i32 = arith.constant 0 : i32
    %c0_i32_0 = arith.constant 0 : i32
    %c0_i32_1 = arith.constant 0 : i32
    return %c0_i32, %c0_i32_0 : i32, i32
  }
  func.func @transform_3(%arg0: i32, %arg1: i32) -> (i32, i32) {
    %c0_i32 = arith.constant 0 : i32
    %c0_i32_0 = arith.constant 0 : i32
    %c0_i32_1 = arith.constant 0 : i32
    return %c0_i32, %c0_i32_0 : i32, i32
  }
  func.func @transform_4(%arg0: i32, %arg1: i32) -> (i32, i32) {
    %c0_i32 = arith.constant 0 : i32
    %c0_i32_0 = arith.constant 0 : i32
    %c0_i32_1 = arith.constant 0 : i32
    return %c0_i32, %c0_i32_0 : i32, i32
  }
  func.func @transform_5(%arg0: i32, %arg1: i32) -> (i32, i32, i32) {
    %c0_i32 = arith.constant 0 : i32
    %c0_i32_0 = arith.constant 0 : i32
    return %arg0, %c0_i32, %arg1 : i32, i32, i32
  }
}

</mosaic_0001>

<bundles_post_ra>
// kernel: tpu_custom_call.1
= control target key start
LH: loop header
LB: loop body
LE: loop exit
PB: predicated region body
PF: predicated region fallthrough
CT: control target
= control target key end

     0   :  { %10 = vsyncpa [#allocation3], 0  ;;  %s950_s0 = inlined_call_operand.vmem [shape: f32[2,4,256], index: 0, kind: input, shape index: {}]   ;;  %s951_s1 = inlined_call_operand.vmem [shape: f32[32,4], index: 1, kind: input, shape index: {}]   ;;  %s952_s2 = inlined_call_operand.vmem [shape: f32[32,1], index: 2, kind: input, shape index: {}]   ;;  %s953_s3 = inlined_call_operand.vmem [shape: f32[4,32], index: 3, kind: input, shape index: {}]   ;;  %s954_s4 = inlined_call_operand.vmem [shape: f32[4,1], index: 4, kind: input, shape index: {}]   ;;  %s955_s5 = inlined_call_operand.hbm [shape: f32[2,4,256], index: 5, kind: output, shape index: {}]  }
   0x1   :  { %12 = vsyncpa [#allocation3 + $0x1], 0  ;;  %s821_s18 = smov 0   ;;  %s823_s19 = smov 0  }
   0x2   :  { %s825_s20 = smov 0   ;;  %s827_s21 = smov 0  }
   0x3   :  { %s829_s22 = smov 0   ;;  %s831_s23 = smov 0  }
   0x4 LB: > { %s612_s24 = sadd.s32 4294967295, %s786_s23   ;;  %s613_s25 = sadd.s32 4294967294, %s786_s23   ;;  %s786_s23 = sphi %s831_s23, %s18_s23   ;;  %s782_s22 = sphi %s829_s22, %s962_s22   ;;  %s778_s21 = sphi %s827_s21, %s961_s21   ;;  %s774_s20 = sphi %s825_s20, %s960_s20   ;;  %s770_s19 = sphi %s823_s19, %s959_s19   ;;  %s766_s18 = sphi %s821_s18, %s958_s18  }
   0x5   : > { %s30_s26 = sadd.s32 1, %s782_s22  ;;  %s151_s27 = sadd.s32 1, %s774_s20 }
   0x6   : > { %p32_p0 = scmp.ge.s32.totalorder %s30_s26, 2  ;;  %p161_p1 = scmp.ne.s32.totalorder %s774_s20, %s770_s19 }
   0x7   : > { %p162_p2 = scmp.eq.s32.totalorder %s612_s24, 1  ;;  %p167_p3 = scmp.ne.s32.totalorder %s770_s19, %s766_s18 }
   0x8   : > { %s964_s26 = smov (%p32_p0, %s30_s26), 0  ;;  %p168_p5 = scmp.eq.s32.totalorder %s613_s25, 1 }
   0x9   : > { %p861_p4 = por %p162_p2, %p161_p1  ;;  %s146_s29 = ssub.s32 %s782_s22, %s964_s26 }
   0xa   : > { %p616_p6 = scmp.ge.s32.totalorder %s786_s23, 1  ;;  %p149_p7 = scmp.eq.s32.totalorder %s146_s29, 0 }
   0xb   : > { %p868_p8 = por %p168_p5, %p167_p3  ;;  %p211_p9 = scmp.lt.s32.totalorder %s786_s23, 3 }
   0xc   : > { %s874_s6 = scalar_select %p149_p7, %s774_s20, %s151_s27  }
   0xd   : > { %p212_p10 = pnand %p616_p6, %p211_p9 }
   0xe   : > { %p244_p11 = scmp.lt.s32.totalorder (!%p212_p10), %s778_s21, 1  ;;  %s240_s17 = sand.u32 (!%p212_p10), 1, %s770_s19  }
   0xf   : > { %215 = sbr.rel (%p212_p10) target bundleno = 479 (0x1df), region = 40  ;;  %s617_s24 = sshll.u32 (!%p212_p10), %s240_s17, 3 }
  0x10   : > { %s242_s27 = scalar_lea.vmem (!%p212_p10), [#allocation2], %s617_s24  ;;  %s520_s10 = scalar_lea.sflag (!%p212_p10), [#allocation3], %s240_s17 }
  0x11   : > { %s536_s29 = sshll.u32 (!%p212_p10), %s242_s27, 4  ;;  %s537_s29 = int_to_ptr.vmem [resolvable:$true] %s536_s29 }
  0x12   : > { %s710_s11 = scalar_lea.vmem (!%p212_p10), %s537_s29, 128 }
  0x13   : > { %p711_p12 = scmp.ne.s32.totalorder (!%p212_p10), %s537_s29, %s710_s11 }
  0x14   : > { %v788_v0 = vmov 0.0   ;;  %v260_v1 = vld [vmem:[%s952_s2 + $0x8] sm:$0xff]  ;;  %s245_s9 = scalar_select %p244_p11, %s778_s21, 1  ;;  %v789_v2 = vmov 0   ;;  %v262_v3 = vld [vmem:[%s952_s2 + $0x18] sm:$0xff]  ;;  %v259_v4 = vld [vmem:[%s952_s2] sm:$0xff] }
  0x15   : > { %367 = vmatprep.mubr.f32.mxu0 %v788_v0  ;;  %507 = vmatprep.mubr.f32.mxu1 %v788_v0  ;;  %v261_v5 = vld [vmem:[%s952_s2 + $0x10] sm:$0xff]  ;;  %vm298_vm0 = vcmask 1043456   ;;  %v255_v8 = vld [vmem:[%s951_s1] sm:$0xff]  ;;  %vm285_vm1 = vcmask 31744   ;;  %v256_v10 = vld [vmem:[%s951_s1 + $0x8] sm:$0xff]  ;;  %vm439_vm2 = vcmask 261120   ;;  %p712_p13 = pnand %p711_p12, %p861_p4 }
  0x16   : > { %692 = vset.pattern.permute.xlu1 %v789_v2  ;;  %691 = vset.pattern.permute.xlu0 %v789_v2  ;;  %s632_s12 = sshll.u32 %s245_s9, 3  ;;  %v433_v9 = vld [vmem:[%s954_s4] sm:$0xf]  ;;  %v257_v11 = vld [vmem:[%s951_s1 + $0x10] sm:$0xff]  ;;  %v258_v12 = vld [vmem:[%s951_s1 + $0x18] sm:$0xff] }
  0x17   : > { %270 = vperm.xlu1 %692, %v260_v1   ;;  %280 = vperm.xlu0 %691, %v262_v3   ;;  %s251_s25 = scalar_lea.vmem %s950_s0, %s632_s12  ;;  %p713_p0 = pneg %p712_p13 }
  0x18   : > { %v254_v6 = vld [vmem:[%s251_s25] sm:$0xff]  ;;  %s633_s25 = sshll.u32 %s778_s21, 7  ;;  %s790_s12 = smov [#allocation2]  }
  0x19   : > { %v284_v7 = vcombine.high %v254_v6, %v254_v6  ;;  %s534_s9 = scalar_lea.hbm %s955_s5, %s633_s25  ;;  %s714_s13 = sshll.u32 %s790_s12, 4  ;;  %s715_s13 = int_to_ptr.vmem [resolvable:$false] %s714_s13 }
  0x1a   : > { %s716_s21 = scalar_lea.vmem %s715_s13, 256  ;;  %p717_p1 = scmp.lt.s32.totalorder %s537_s29, %s715_s13 }
  0x1b   : > { %265 = vperm.xlu1 %692, %v259_v4   ;;  %275 = vperm.xlu0 %691, %v261_v5   ;;  %p718_p2 = scmp.lt.s32.totalorder %s716_s21, %s710_s11 }
  0x1c   : > { %620 = vmatprep.subr.msk.mxu0 %vm298_vm0, %v284_v7 }
  0x1d   : > { %621 = vmatpush1.msk.msra.mxu0 %vm298_vm0, %v254_v6  ;;  %p719_p3 = por %p718_p2, %p717_p1 }
  0x1e   : > { %622 = vmatmul.mubr.msk.f32.vlgmr.msra.gmra.mxu0 %vm285_vm1, %v255_v8 }
  0x1f   : > { %436 = vperm.xlu0 %691, %v433_v9   ;;  %373 = vmatprep.mubr.f32.mxu0 %v788_v0  ;;  %v432_v9 = vld [vmem:[%s953_s3] sm:$0xf]  ;;  %p720_p5 = pnand %p719_p3, %p713_p0 }
  0x22   : > { %623 = vmatmul.mubr.msk.f32.gmra.mxu0 %vm285_vm1, %v256_v10 }
  0x23   : > { %379 = vmatprep.mubr.f32.mxu0 %v788_v0 }
  0x26   : > { %624 = vmatmul.mubr.msk.f32.gmra.mxu0 %vm285_vm1, %v257_v11 }
  0x27   : > { %385 = vmatprep.mubr.f32.mxu0 %v788_v0 }
  0x2a   : > { %625 = vmatmul.mubr.msk.f32.gmra.mxu0 %vm285_vm1, %v258_v12 }
  0x92   : > { %v281_v14 = vpop.permute.xlu0 %280  ;;  %v271_v17 = vpop.permute.xlu1 %270 }
  0x96   : > { %v276_v20 = vpop.permute.xlu0 %275  ;;  %v266_v24 = vpop.permute.xlu1 %265 }
  0x9a   : > { %v437_v11 = vpop.permute.xlu0 %436 }
  0xde   : > { %v369_v13 = vpop.f32.mrf.mxu0 }
  0xdf   : > { %v370_v32 = vadd.f32 %v369_v13, %v266_v24 }
  0xe0   : > { %v371_v15 = vpop.f32.mrf.mxu0 }
  0xe1   : > { %v372_v29 = vadd.f32 %v371_v15, %v266_v24  ;;  %v400_v40 = vmul.f32 0.70710677, %v370_v32  ;;  %v392_v5 = vmul.f32 0.5, %v370_v32 }
  0xe2   : > { %v375_v16 = vpop.f32.mrf.mxu0 }
  0xe3   : > { %v376_v27 = vadd.f32 %v375_v16, %v271_v17  ;;  %v401_v38 = vmul.f32 0.70710677, %v372_v29  ;;  %v393_v3 = vmul.f32 0.5, %v372_v29 }
  0xe4   : > { %v377_v18 = vpop.f32.mrf.mxu0 }
  0xe5   : > { %v378_v19 = vadd.f32 %v377_v18, %v271_v17  ;;  %v402_v37 = vmul.f32 0.70710677, %v376_v27  ;;  %v394_v0 = vmul.f32 0.5, %v376_v27 }
  0xe6   : > { %v381_v21 = vpop.f32.mrf.mxu0 }
  0xe7   : > { %v382_v22 = vadd.f32 %v381_v21, %v276_v20  ;;  %v403_v25 = vmul.f32 0.70710677, %v378_v19  ;;  %v395_v61 = vmul.f32 0.5, %v378_v19 }
  0xe8   : > { %v383_v23 = vpop.f32.mrf.mxu0 }
  0xe9   : > { %v384_v26 = vadd.f32 %v383_v23, %v276_v20  ;;  %v404_v33 = vmul.f32 0.70710677, %v382_v22  ;;  %694 = verf.f32 %v403_v25  ;;  %v396_v58 = vmul.f32 0.5, %v382_v22 }
  0xea   : > { %v387_v28 = vpop.f32.mrf.mxu0 }
  0xeb   : > { %v405_v30 = vmul.f32 0.70710677, %v384_v26  ;;  %v388_v31 = vadd.f32 %v387_v28, %v281_v14  ;;  %v397_v55 = vmul.f32 0.5, %v384_v26 }
  0xec   : > { %v389_v34 = vpop.f32.mrf.mxu0 }
  0xed   : > { %v406_v35 = vmul.f32 0.70710677, %v388_v31  ;;  %v390_v36 = vadd.f32 %v389_v34, %v281_v14  ;;  %696 = verf.f32 %v405_v30  ;;  %v398_v52 = vmul.f32 0.5, %v388_v31 }
  0xef   : > { %698 = verf.f32 %v406_v35  ;;  %v407_v39 = vmul.f32 0.70710677, %v390_v36  ;;  %v399_v48 = vmul.f32 0.5, %v390_v36 }
  0xf0   : > { %700 = verf.f32 %v404_v33 }
  0xf1   : > { %702 = verf.f32 %v407_v39 }
  0xf2   : > { %704 = verf.f32 %v402_v37 }
  0xf3   : > { %706 = verf.f32 %v401_v38 }
  0xf4   : > { %708 = verf.f32 %v400_v40 }
  0xf6   : > { %v695_v41 = vpop.eup %694 }
  0xf7   : > { %v419_v57 = vadd.f32 1.0, %v695_v41 }
  0xf9   : > { %v427_v4 = vmul.f32 %v419_v57, %v395_v61 }
  0xfa   : > { %v697_v42 = vpop.eup %696 }
  0xfb   : > { %v421_v50 = vadd.f32 1.0, %v697_v42 }
  0xfc   : > { %v699_v43 = vpop.eup %698 }
  0xfd   : > { %v701_v44 = vpop.eup %700  ;;  %v422_v46 = vadd.f32 1.0, %v699_v43  ;;  %v429_v62 = vmul.f32 %v421_v50, %v397_v55 }
  0xfe   : > { %v703_v45 = vpop.eup %702  ;;  %v420_v53 = vadd.f32 1.0, %v701_v44 }
  0xff   : > { %v705_v47 = vpop.eup %704  ;;  %v423_v49 = vadd.f32 1.0, %v703_v45  ;;  %v430_v59 = vmul.f32 %v422_v46, %v398_v52 }
 0x100   : > { %v707_v51 = vpop.eup %706  ;;  %v418_v60 = vadd.f32 1.0, %v705_v47  ;;  %v428_v1 = vmul.f32 %v420_v53, %v396_v58 }
 0x101   : > { %v709_v54 = vpop.eup %708  ;;  %v431_v56 = vmul.f32 %v423_v49, %v399_v48  ;;  %v417_v63 = vadd.f32 1.0, %v707_v51 }
 0x102   : > { %v416_v2 = vadd.f32 1.0, %v709_v54  ;;  %v426_v6 = vmul.f32 %v418_v60, %v394_v0 }
 0x103   : > { %467 = vmatprep.subr.mxu1 %v431_v56  ;;  %v425_v7 = vmul.f32 %v417_v63, %v393_v3 }
 0x104   : > { %468 = vmatpush1.msra.mxu1 %v430_v59  ;;  %v424_v8 = vmul.f32 %v416_v2, %v392_v5 }
 0x105   : > { %469 = vmatprep.subr.mxu1 %v429_v62 }
 0x106   : > { %470 = vmatpush1.msra.mxu1 %v428_v1 }
 0x107   : > { %471 = vmatprep.subr.mxu1 %v427_v4 }
 0x108   : > { %472 = vmatpush1.msra.mxu1 %v426_v6 }
 0x109   : > { %473 = vmatprep.subr.mxu1 %v425_v7 }
 0x10a   : > { %474 = vmatpush1.msra.mxu1 %v424_v8 }
 0x10b   : > { %626 = vmatmul.mubr.msk.f32.vlgmr.msra.gmra.mxu1 %vm439_vm2, %v432_v9 }
 0x1cb   : > { %v509_v10 = vpop.f32.mrf.mxu1 }
 0x1cc   : > { %v510_v13 = vadd.f32 %v509_v10, %v437_v11 }
 0x1cd   : > { %v511_v12 = vpop.f32.mrf.mxu1 }
 0x1ce   : > { %v512_v14 = vadd.f32 %v511_v12, %v437_v11 }
 0x1d0   : > { %v516_v15 = vcombine.low %v510_v13, %v512_v14 }
 0x1d2   : > { %518 = vst [vmem:[%s242_s27] sm:$0xff] %v516_v15 }
 0x1d3   : > { %723 = shalt.err (!%p720_p5)
}
 0x1d4   : > { %s724_s14 = scalar_lea.hbm %s534_s9, 128  ;;  %s728_s17 = scalar_lea.hbm %s955_s5, 256 }
 0x1d5   : > { %p725_p6 = scmp.ne.s32.totalorder %s534_s9, %s724_s14  ;;  %p729_p10 = scmp.lt.s32.totalorder %s534_s9, %s955_s5 }
 0x1d6   : > { %p730_p11 = scmp.lt.s32.totalorder %s728_s17, %s724_s14 }
 0x1d7   : > { %p726_p7 = pnand %p725_p6, %p861_p4 }
 0x1d8   : > { %p731_p12 = por %p730_p11, %p729_p10 }
 0x1d9   : > { %p727_p9 = pneg %p726_p7 }
 0x1db   : > { %p732_p13 = pnand %p731_p12, %p727_p9 }
 0x1dd   : > { %735 = shalt.err (!%p732_p13)
}
 0x1de   : > { %634 = dma.vmem_to_hbm [thread:$0]  (%p861_p4), %s537_s29, 128, %s534_s9, %s520_s10  }
 0x1df PF: > { %p640_p0 = scmp.ge.s32.totalorder %s786_s23, 2  ;;  %s548_s27 = sand.u32 1, %s766_s18  }
 0x1e0   : > { %s549_s7 = scalar_lea.sflag [#allocation3], %s548_s27 }
 0x1e1   : > { %p637_p1 = pnand %p640_p0, %p868_p8 }
 0x1e3   : > { %p638_p2 = pneg %p637_p1 }
 0x1e5   : > { %761 = dma.done.wait (%p638_p2), %s549_s7, 128  }
 0x1e6   : > { %763 = vsyncadd (%p638_p2), %s549_s7, 4294967168  ;;  %s18_s23 = sadd.s32 1, %s786_s23   ;;  %s958_s18 = smov %s770_s19 }
 0x1e7   : > { %p15_p3 = scmp.ge.s32.totalorder %s18_s23, 4   ;;  %s959_s19 = smov %s774_s20 }
 0x1e8   : > { %s960_s20 = smov %s874_s6  ;;  %s961_s21 = smov %s782_s22 }
 0x1e9   : > { %s962_s22 = smov %s964_s26  ;;  %17 = sbr.rel (!%p15_p3) target bundleno = 4 (0x4), region = 75 }
 0x1ee   :  { %554 = vsyncpa [#allocation3], 1 }
 0x1ef   :  { %556 = vsyncpa [#allocation3 + $0x1], 1 }

</bundles_post_ra>
